<compile_context>
chip_gen: v7x
topology: tpu7x:2x2x1
jax: 0.10.0
libtpu: 0.0.40
codegen_flags: <defaults>
</compile_context>

<pallas_src>
import numpy as np
import jax
import jax.numpy as jnp
from jax.experimental import pallas as pl
from jax.experimental.pallas import tpu as pltpu

SFREQ = 500
MORL_CENTRAL_FREQ = 0.8125  # == pywt.central_frequency('morl'), deterministic constant


# ----------------------------------------------------------------------------
# Host glue: exact linear operator of pywt.cwt('morl') + band averaging
# ----------------------------------------------------------------------------
def _morlet_int_psi(precision=10):
    # pywt 'morl': psi(t) = exp(-t^2/2)*cos(5t) on linspace(-8, 8, 2**p);
    # integrate_wavelet = cumulative sum * step.
    x = np.linspace(-8.0, 8.0, 2 ** precision)
    psi = np.exp(-x ** 2 / 2.0) * np.cos(5.0 * x)
    step = x[1] - x[0]
    return np.cumsum(psi) * step, x


def _int_psi_scale(int_psi, x, scale):
    # Mirrors pywt.cwt's per-scale kernel construction.
    step = x[1] - x[0]
    j = np.arange(scale * (x[-1] - x[0]) + 1) / (scale * step)
    j = j.astype(int)
    j = j[j < int_psi.size]
    return int_psi[j][::-1]


def _cwt_matrix(k, scale, n_samples):
    # coef = -sqrt(scale) * diff(convolve(signal, k)), center-trimmed.
    # M[t, s] = -sqrt(scale) * (K(o + t + 1 - s) - K(o + t - s)),
    # o = floor((L - 2) / 2), K(i) = k[i] for 0 <= i < L else 0.
    L = k.shape[0]
    o = (L - 2) // 2
    t = np.arange(n_samples)[:, None]
    s = np.arange(n_samples)[None, :]
    idx = o + t - s

    def K(i):
        out = np.zeros(i.shape, dtype=np.float64)
        m = (i >= 0) & (i < L)
        out[m] = k[i[m]]
        return out

    return -np.sqrt(scale) * (K(idx + 1) - K(idx))


def build_band_operators(n_samples, sfreq=SFREQ):
    """Returns B of shape (3, S_out, S_in) float64 such that
    band_output[b, t] = sum_s B[b, t, s] * signal[s]  (exact CWT + band mean)."""
    freqs = np.linspace(1, 12, 30)
    scales = MORL_CENTRAL_FREQ * sfreq / freqs
    int_psi, x = _morlet_int_psi(precision=10)
    mats = np.stack(
        [_cwt_matrix(_int_psi_scale(int_psi, x, a), a, n_samples) for a in scales]
    )  # (30, S_out, S_in)

    band_edges = np.array([0, 4, 8, 12])
    bands = []
    for i in range(len(band_edges) - 1):
        fmin, fmax = band_edges[i], band_edges[i + 1]
        idxs = np.where((freqs >= fmin) & (freqs < fmax))[0]
        if len(idxs) > 0:
            bands.append(mats[idxs].mean(axis=0))
        else:
            bands.append(np.zeros((n_samples, n_samples)))
    return np.stack(bands)  # (3, S_out, S_in) float64


def _round_up(v, m):
    return ((v + m - 1) // m) * m


def fuse_pad_cast_filters(band_ops, s_pad=None):
    """Host-side, once per filter bank: (3, S_out, S_in) -> fused (S_pad, 3*S_pad)
    bf16 RHS in x@W layout (time-in on rows); band b's output time t lives in
    column b*S_pad + t.  Padding + bf16 cast happen here so the per-call device
    path never touches the filter bank again."""
    _, s_out, s_in = band_ops.shape
    if s_pad is None:
        s_pad = _round_up(s_in, 128)
    w = np.zeros((s_pad, 3 * s_pad), dtype=np.float32)
    for b in range(3):
        w[:s_in, b * s_pad:b * s_pad + s_out] = band_ops[b].T
    # TODO(synk): on v7x an fp8(e4m3)+per-band-scale copy of W would halve the
    # dominant HBM traffic; kept bf16 so the same filters run on v5e/v6e.
    return jnp.asarray(w).astype(jnp.bfloat16)


# ----------------------------------------------------------------------------
# Pallas kernel: fused-band, (tn, tk)-tiled matmul with f32 accumulator
# ----------------------------------------------------------------------------
def _fused_band_matmul_kernel(x_ref, w_ref, o_ref, acc_ref):
    # x_ref: (NC_pad, tk) bf16 signals; w_ref: (tk, tn) bf16 fused band filters;
    # o_ref / acc_ref: (NC_pad, tn) f32 — full-width, unmasked stores only.
    k = pl.program_id(1)

    @pl.when(k == 0)
    def _init():
        acc_ref[...] = jnp.zeros_like(acc_ref)

    acc_ref[...] += jnp.dot(
        x_ref[...], w_ref[...], preferred_element_type=jnp.float32
    )

    @pl.when(k == pl.num_programs(1) - 1)
    def _finalize():
        o_ref[...] = acc_ref[...]


def _vmem_caps():
    """(tile budget, scoped vmem limit), generation-aware: ~87/100 MiB on
    128-MiB chips (v5e/v6e), ~43/51 MiB on 64-MiB v7x."""
    try:
        cap = int(pltpu.get_tpu_info().vmem_capacity_bytes)
    except Exception:
        cap = 64 * 1024 * 1024  # conservative fallback (v7x per-core VMEM)
    return int(cap * 0.68), int(cap * 0.80)


def _choose_tiles(s_pad, nc_pad, budget_bytes):
    """Largest (tn, tk), 128-aligned divisors of (3*S_pad, S_pad), fitting budget."""
    n_total = 3 * s_pad
    tn_cands = sorted(
        {t for t in (n_total, 2048, 1536, 1024, 768, 512, 384, 256, 128)
         if t <= min(n_total, 2048) and n_total % t == 0 and t % 128 == 0},
        reverse=True)
    tk_cands = sorted(
        {t for t in (s_pad, 4096, 2048, 1024, 512, 256, 128)
         if t <= s_pad and s_pad % t == 0 and t % 128 == 0},
        reverse=True)
    for tn in tn_cands:
        for tk in tk_cands:
            need = (
                2 * nc_pad * tk * 2      # x blocks (bf16, double-buffered)
                + 2 * tk * tn * 2        # W blocks (bf16, double-buffered)
                + 2 * nc_pad * tn * 4    # output blocks (f32, double-buffered)
                + nc_pad * tn * 4        # f32 accumulator scratch
            )
            if need <= budget_bytes:
                return tn, tk
    return tn_cands[-1], tk_cands[-1]


def wavelet_transform_3channel(x, w_fused):
    """x: (N, Chans, Samples); w_fused: (S_pad, 3*S_pad) bf16 from
    fuse_pad_cast_filters.  Returns (N, 3, Chans, Samples) float32, matching
    the PyTorch module."""
    N, C, S = x.shape
    S_pad = w_fused.shape[0]
    assert w_fused.shape == (S_pad, 3 * S_pad) and S <= S_pad
    NC = N * C
    NC_pad = _round_up(NC, 16)  # full bf16 sublane packing; unmasked vld/vst

    x2d = jnp.asarray(x, jnp.float32).reshape(NC, S)
    if NC_pad != NC or S_pad != S:
        x2d = jnp.pad(x2d, ((0, NC_pad - NC), (0, S_pad - S)))
    x2d = x2d.astype(jnp.bfloat16)

    budget, vmem_limit = _vmem_caps()
    tn, tk = _choose_tiles(S_pad, NC_pad, budget)
    nn = (3 * S_pad) // tn
    nk = S_pad // tk

    cost = pl.CostEstimate(
        flops=2 * NC_pad * S_pad * 3 * S_pad,
        transcendentals=0,
        bytes_accessed=(
            nn * NC_pad * S_pad * 2      # x re-read once per output tile
            + S_pad * 3 * S_pad * 2      # fused filter bank read once
            + NC_pad * 3 * S_pad * 4     # f32 output written once
        ),
    )

    out = pl.pallas_call(
        _fused_band_matmul_kernel,
        out_shape=jax.ShapeDtypeStruct((NC_pad, 3 * S_pad), jnp.float32),
        grid_spec=pltpu.PrefetchScalarGridSpec(
            num_scalar_prefetch=0,
            grid=(nn, nk),  # (output-time tile, K tile); K innermost for the accumulator
            in_specs=[
                pl.BlockSpec((NC_pad, tk), lambda n, k: (0, k)),  # signals
                pl.BlockSpec((tk, tn), lambda n, k: (k, n)),      # fused band filters
            ],
            out_specs=pl.BlockSpec((NC_pad, tn), lambda n, k: (0, n)),
            scratch_shapes=[pltpu.VMEM((NC_pad, tn), jnp.float32)],
        ),
        compiler_params=pltpu.CompilerParams(
            # Output-time tiles are independent -> v7x's 2 TensorCores split them.
            dimension_semantics=("parallel", "arbitrary"),
            vmem_limit_bytes=vmem_limit,
        ),
        cost_estimate=cost,
    )(x2d, w_fused)

    # (NC_pad, 3*S_pad) slab -> (N, 3, C, S).  Small output; cheap wrapper-side
    # relayout keeps every kernel store full-width and unmasked.
    out = out[:NC].reshape(N, C, 3, S_pad)[..., :S]
    return jnp.transpose(out, (0, 2, 1, 3))


if __name__ == "__main__":
    key = jax.random.PRNGKey(0)
    N, C, S = 2, 4, 128  # small (N, Chans, Samples) consistent with the module
    x = jax.random.normal(key, (N, C, S), dtype=jnp.float32)

    B = build_band_operators(S, sfreq=SFREQ)   # (3, S, S) float64, host-side
    w_fused = fuse_pad_cast_filters(B)         # (S_pad, 3*S_pad) bf16, built once

    y = wavelet_transform_3channel(x, w_fused)
    y = jax.block_until_ready(y)
    assert y.shape == (N, 3, C, S), y.shape
    assert y.dtype == jnp.float32

    # Reference: same linear operator applied in float64 (validates the bf16-MXU
    # fused-band Pallas matmul and the wrapper relayout to (N, 3, C, S)).
    ref = np.einsum("bts,ncs->nbct", B, np.asarray(x, np.float64)).astype(np.float32)
    np.testing.assert_allclose(
        np.asarray(y), ref, rtol=5e-2, atol=1e-2 * (np.abs(ref).max() + 1.0)
    )

    print("KERNEL_OK")
</pallas_src>

<mosaic_0001>
module attributes {stable_mosaic.version = 11 : i64} {
  func.func @_fused_band_matmul_kernel(%arg0: i32, %arg1: i32, %arg2: memref<16x128xbf16, #tpu.memory_space<vmem>>, %arg3: memref<128x384xbf16, #tpu.memory_space<vmem>>, %arg4: memref<16x384xf32, #tpu.memory_space<vmem>>, %arg5: memref<16x384xf32, #tpu.memory_space<vmem>>) attributes {dimension_semantics = [#tpu.dimension_semantics<parallel>, #tpu.dimension_semantics<arbitrary>], iteration_bounds = array<i64: 1, 1>, scalar_prefetch = 0 : i64, scratch_operands = 1 : i64, tpu.core_type = #tpu.core_type<tc>, window_params = [{transform_indices = @transform_0, window_bounds = array<i64: 16, 128>}, {transform_indices = @transform_1, window_bounds = array<i64: 128, 384>}, {transform_indices = @transform_2, window_bounds = array<i64: 16, 384>}]} {
    %c0_i32 = arith.constant 0 : i32
    %0 = arith.cmpi eq, %arg1, %c0_i32 : i32
    %1 = arith.extui %0 : i1 to i32
    %c0_i32_0 = arith.constant 0 : i32
    %2 = arith.cmpi ne, %1, %c0_i32_0 : i32
    scf.if %2 {
      %cst_10 = arith.constant 0.000000e+00 : f32
      %12 = vector.broadcast %cst_10 : f32 to vector<16x384xf32>
      %c0_11 = arith.constant 0 : index
      %c0_12 = arith.constant 0 : index
      %13 = vector.load %arg5[%c0_11, %c0_12] : memref<16x384xf32, #tpu.memory_space<vmem>>, vector<16x384xf32>
      tpu.vector_store %arg5[%c0_11, %c0_12], %12 {strides = array<i32>} : memref<16x384xf32, #tpu.memory_space<vmem>>, vector<16x384xf32>,
    } else {
    }
    %c0 = arith.constant 0 : index
    %c0_1 = arith.constant 0 : index
    %3 = vector.load %arg5[%c0, %c0_1] : memref<16x384xf32, #tpu.memory_space<vmem>>, vector<16x384xf32>
    %c0_2 = arith.constant 0 : index
    %c0_3 = arith.constant 0 : index
    %4 = vector.load %arg2[%c0_2, %c0_3] : memref<16x128xbf16, #tpu.memory_space<vmem>>, vector<16x128xbf16>
    %c0_4 = arith.constant 0 : index
    %c0_5 = arith.constant 0 : index
    %5 = vector.load %arg3[%c0_4, %c0_5] : memref<128x384xbf16, #tpu.memory_space<vmem>>, vector<128x384xbf16>
    %cst = arith.constant dense<0.000000e+00> : vector<16x384xf32>
    %6 = tpu.matmul %4, %5, %cst {dimension_numbers = #tpu.dot_dimension_numbers<[1], [0], [0], [1], [0, 0, 1, 1], [], []>} : vector<16x128xbf16>, vector<128x384xbf16>, vector<16x384xf32> -> vector<16x384xf32>
    %7 = arith.addf %3, %6 : vector<16x384xf32>
    %c0_6 = arith.constant 0 : index
    %c0_7 = arith.constant 0 : index
    %8 = vector.load %arg5[%c0_6, %c0_7] : memref<16x384xf32, #tpu.memory_space<vmem>>, vector<16x384xf32>
    tpu.vector_store %arg5[%c0_6, %c0_7], %7 {strides = array<i32>} : memref<16x384xf32, #tpu.memory_space<vmem>>, vector<16x384xf32>,
    %c0_i32_8 = arith.constant 0 : i32
    %9 = arith.cmpi eq, %arg1, %c0_i32_8 : i32
    %10 = arith.extui %9 : i1 to i32
    %c0_i32_9 = arith.constant 0 : i32
    %11 = arith.cmpi ne, %10, %c0_i32_9 : i32
    scf.if %11 {
      %c0_10 = arith.constant 0 : index
      %c0_11 = arith.constant 0 : index
      %12 = vector.load %arg5[%c0_10, %c0_11] : memref<16x384xf32, #tpu.memory_space<vmem>>, vector<16x384xf32>
      %c0_12 = arith.constant 0 : index
      %c0_13 = arith.constant 0 : index
      %13 = vector.load %arg4[%c0_12, %c0_13] : memref<16x384xf32, #tpu.memory_space<vmem>>, vector<16x384xf32>
      tpu.vector_store %arg4[%c0_12, %c0_13], %12 {strides = array<i32>} : memref<16x384xf32, #tpu.memory_space<vmem>>, vector<16x384xf32>,
    } else {
    }
    return
  }
  func.func @transform_0(%arg0: i32, %arg1: i32) -> (i32, i32) {
    %c0_i32 = arith.constant 0 : i32
    %c0_i32_0 = arith.constant 0 : i32
    return %c0_i32, %arg1 : i32, i32
  }
  func.func @transform_1(%arg0: i32, %arg1: i32) -> (i32, i32) {
    %c0_i32 = arith.constant 0 : i32
    return %arg1, %arg0 : i32, i32
  }
  func.func @transform_2(%arg0: i32, %arg1: i32) -> (i32, i32) {
    %c0_i32 = arith.constant 0 : i32
    %c0_i32_0 = arith.constant 0 : i32
    return %c0_i32, %arg0 : i32, i32
  }
}

</mosaic_0001>

<bundles_post_ra>
// kernel: tpu_custom_call.1
= control target key start
LH: loop header
LB: loop body
LE: loop exit
PB: predicated region body
PF: predicated region fallthrough
CT: control target
= control target key end

     0   :  { %7 = vsyncpa [#allocation4], 0  ;;  %s588_s0 = inlined_call_operand.hbm [shape: bf16[16,128], index: 0, kind: input, shape index: {}]   ;;  %s589_s1 = inlined_call_operand.hbm [shape: bf16[128,384], index: 1, kind: input, shape index: {}]   ;;  %s590_s2 = inlined_call_operand.hbm [shape: f32[16,384], index: 2, kind: output, shape index: {}]  }
   0x1   :  { %8 = vsyncpa [#allocation7], 0 }
   0x2   :  { %9 = vsyncpa [#allocation5], 0  ;;  %s525_s9 = smov [#allocation3]   ;;  %s453_s13 = scalar_lea.hbm %s588_s0, 128 }
   0x3   :  { %s15_s10 = sshll.u32 %s525_s9, 4  ;;  %p454_p0 = scmp.ne.s32.totalorder %s588_s0, %s453_s13  ;;  %s16_s10 = int_to_ptr.vmem [resolvable:$true] %s15_s10 }
   0x4   :  { %p457_p1 = scmp.lt.u32.totalorder %s453_s13, %s588_s0 }
   0x6   :  { %p459_p2 = pnand %p457_p1, %p454_p0 }
   0x8   :  { %462 = shalt.err (!%p459_p2)
}
   0x9   :  { %s463_s18 = scalar_lea.vmem %s16_s10, 128  ;;  %p468_p4 = scmp.lt.s32.totalorder %s16_s10, %s16_s10 }
   0xa   :  { %p464_p3 = scmp.ne.s32.totalorder %s16_s10, %s463_s18  ;;  %p469_p5 = scmp.lt.s32.totalorder %s463_s18, %s463_s18 }
   0xc   :  { %p470_p6 = por %p469_p5, %p468_p4 }
   0xe   :  { %p471_p7 = pnand %p470_p6, %p464_p3 }
  0x10   :  { %474 = shalt.err (!%p471_p7)
}
  0x11   :  { %s526_s19 = smov 64   ;;  %s527_s20 = smov 4  }
  0x12   :  { %21 = dma.hbm_to_vmem [thread:$0]  %s588_s0, 128, %s16_s10, [#allocation4], %s526_s19, %s526_s19, %s527_s20  }
  0x13   :  { %s528_s23 = smov [#allocation6]   ;;  %s475_s27 = scalar_lea.hbm %s589_s1, 3072 }
  0x14   :  { %s27_s24 = sshll.u32 %s528_s23, 4  ;;  %p476_p8 = scmp.ne.s32.totalorder %s589_s1, %s475_s27  ;;  %s28_s24 = int_to_ptr.vmem [resolvable:$true] %s27_s24 }
  0x15   :  { %p479_p9 = scmp.lt.u32.totalorder %s475_s27, %s589_s1 }
  0x17   :  { %p481_p10 = pnand %p479_p9, %p476_p8 }
  0x19   :  { %484 = shalt.err (!%p481_p10)
}
  0x1a   :  { %s485_s4 = scalar_lea.vmem %s28_s24, 3072  ;;  %p490_p12 = scmp.lt.s32.totalorder %s28_s24, %s28_s24 }
  0x1b   :  { %p486_p11 = scmp.ne.s32.totalorder %s28_s24, %s485_s4  ;;  %p491_p13 = scmp.lt.s32.totalorder %s485_s4, %s485_s4 }
  0x1d   :  { %p492_p0 = por %p491_p13, %p490_p12 }
  0x1f   :  { %p493_p1 = pnand %p492_p0, %p486_p11 }
  0x21   :  { %496 = shalt.err (!%p493_p1)
}
  0x22   :  { %s529_s0 = smov 192   ;;  %s530_s5 = smov 12  }
  0x23   :  { %33 = dma.hbm_to_vmem [thread:$0]  %s589_s1, 3072, %s28_s24, [#allocation7], %s529_s0, %s529_s0, %s530_s5  }
  0x24   :  { %519 = dma.done.wait [#allocation4], 128  }
  0x25   :  { %520 = vsyncadd [#allocation4], 4294967168 }
  0x26   :  { %521 = dma.done.wait [#allocation7], 3072  }
  0x27   :  { %522 = vsyncadd [#allocation7], 4294964224  ;;  %v531_v0 = vmov 0.0   ;;  %vm532_vm0 = vmmov 0   ;;  %v533_v1 = vmov 0   ;;  %v452_v26 = vld [vmem:[#allocation3] sm:$0xff]  }
  0x28   :  { %388 = vmatprep.subr.bf16.mxu1 %v531_v0  ;;  %404 = vmatprep.mubr.msk.bf16.mxu1 %vm532_vm0, %v531_v0  ;;  %v420_v2 = vld [vmem:[#allocation6 + $0x4] ss:$12 sps:$4 sm:$0xff]   ;;  %v422_v3 = vld [vmem:[#allocation6 + $0x8] ss:$12 sps:$4 sm:$0xff]   ;;  %v423_v4 = vld [vmem:[#allocation6] ss:$12 sps:$4 sm:$0xff]  }
  0x29   :  { %257 = vmatprep.mubr.bf16.mxu0 %v533_v1  ;;  %225 = vmatprep.subr.bf16.mxu0 %v420_v2  ;;  %v424_v5 = vld [vmem:[#allocation6 + $0x1c] ss:$12 sps:$4 sm:$0xff]   ;;  %v426_v6 = vld [vmem:[#allocation6 + $0x20] ss:$12 sps:$4 sm:$0xff]   ;;  %v427_v7 = vld [vmem:[#allocation6 + $0x18] ss:$12 sps:$4 sm:$0xff]  }
  0x2a   :  { %389 = vmatpush3.bf16.msra.mxu1 %v422_v3  ;;  %226 = vmatpush1.bf16.msra.mxu0 %v423_v4  ;;  %v428_v8 = vld [vmem:[#allocation6 + $0x34] ss:$12 sps:$4 sm:$0xff]   ;;  %v430_v9 = vld [vmem:[#allocation6 + $0x38] ss:$12 sps:$4 sm:$0xff]   ;;  %v431_v10 = vld [vmem:[#allocation6 + $0x30] ss:$12 sps:$4 sm:$0xff]  }
  0x2b   :  { %390 = vmatprep.subr.bf16.mxu1 %v531_v0  ;;  %227 = vmatprep.subr.bf16.mxu0 %v424_v5  ;;  %v432_v11 = vld [vmem:[#allocation6 + $0x4c] ss:$12 sps:$4 sm:$0xff]   ;;  %v434_v12 = vld [vmem:[#allocation6 + $0x50] ss:$12 sps:$4 sm:$0xff]   ;;  %v435_v13 = vld [vmem:[#allocation6 + $0x48] ss:$12 sps:$4 sm:$0xff]  }
  0x2c   :  { %v436_v14 = vld [vmem:[#allocation6 + $0x64] ss:$12 sps:$4 sm:$0xff]   ;;  %v438_v15 = vld [vmem:[#allocation6 + $0x68] ss:$12 sps:$4 sm:$0xff]   ;;  %v439_v16 = vld [vmem:[#allocation6 + $0x60] ss:$12 sps:$4 sm:$0xff]  }
  0x2d   :  { %v440_v17 = vld [vmem:[#allocation6 + $0x7c] ss:$12 sps:$4 sm:$0xff]   ;;  %v442_v18 = vld [vmem:[#allocation6 + $0x80] ss:$12 sps:$4 sm:$0xff]   ;;  %v443_v19 = vld [vmem:[#allocation6 + $0x78] ss:$12 sps:$4 sm:$0xff]  }
  0x2e   :  { %391 = vmatpush3.bf16.msra.mxu1 %v426_v6  ;;  %228 = vmatpush1.bf16.msra.mxu0 %v427_v7  ;;  %v444_v20 = vld [vmem:[#allocation6 + $0x94] ss:$12 sps:$4 sm:$0xff]   ;;  %v446_v21 = vld [vmem:[#allocation6 + $0x98] ss:$12 sps:$4 sm:$0xff]   ;;  %v447_v22 = vld [vmem:[#allocation6 + $0x90] ss:$12 sps:$4 sm:$0xff]  }
  0x2f   :  { %392 = vmatprep.subr.bf16.mxu1 %v531_v0  ;;  %229 = vmatprep.subr.bf16.mxu0 %v428_v8  ;;  %v448_v23 = vld [vmem:[#allocation6 + $0xac] ss:$12 sps:$4 sm:$0xff]   ;;  %v450_v24 = vld [vmem:[#allocation6 + $0xb0] ss:$12 sps:$4 sm:$0xff]   ;;  %v451_v25 = vld [vmem:[#allocation6 + $0xa8] ss:$12 sps:$4 sm:$0xff]  }
  0x30   :  { %s534_s1 = smov [#allocation8]  }
  0x31   :  { %s341_s8 = sshll.u32 %s534_s1, 4  ;;  %s342_s8 = int_to_ptr.vmem [resolvable:$true] %s341_s8 }
  0x32   :  { %393 = vmatpush3.bf16.msra.mxu1 %v430_v9  ;;  %230 = vmatpush1.bf16.msra.mxu0 %v431_v10  ;;  %s497_s9 = scalar_lea.vmem %s342_s8, 768  ;;  %p502_p3 = scmp.lt.s32.totalorder %s342_s8, %s342_s8 }
  0x33   :  { %394 = vmatprep.subr.bf16.mxu1 %v531_v0  ;;  %231 = vmatprep.subr.bf16.mxu0 %v432_v11  ;;  %p498_p2 = scmp.ne.s32.totalorder %s342_s8, %s497_s9  ;;  %p503_p4 = scmp.lt.s32.totalorder %s497_s9, %s497_s9 }
  0x35   :  { %p504_p5 = por %p503_p4, %p502_p3 }
  0x36   :  { %395 = vmatpush3.bf16.msra.mxu1 %v434_v12  ;;  %232 = vmatpush1.bf16.msra.mxu0 %v435_v13 }
  0x37   :  { %396 = vmatprep.subr.bf16.mxu1 %v531_v0  ;;  %233 = vmatprep.subr.bf16.mxu0 %v436_v14  ;;  %p505_p6 = pnand %p504_p5, %p498_p2 }
  0x3a   :  { %397 = vmatpush3.bf16.msra.mxu1 %v438_v15  ;;  %234 = vmatpush1.bf16.msra.mxu0 %v439_v16 }
  0x3b   :  { %398 = vmatprep.subr.bf16.mxu1 %v531_v0  ;;  %235 = vmatprep.subr.bf16.mxu0 %v440_v17 }
  0x3e   :  { %399 = vmatpush3.bf16.msra.mxu1 %v442_v18  ;;  %236 = vmatpush1.bf16.msra.mxu0 %v443_v19 }
  0x3f   :  { %400 = vmatprep.subr.bf16.mxu1 %v531_v0  ;;  %237 = vmatprep.subr.bf16.mxu0 %v444_v20 }
  0x42   :  { %401 = vmatpush3.bf16.msra.mxu1 %v446_v21  ;;  %238 = vmatpush1.bf16.msra.mxu0 %v447_v22 }
  0x43   :  { %402 = vmatprep.subr.bf16.mxu1 %v531_v0  ;;  %239 = vmatprep.subr.bf16.mxu0 %v448_v23 }
  0x46   :  { %403 = vmatpush3.bf16.msra.mxu1 %v450_v24  ;;  %240 = vmatpush1.bf16.msra.mxu0 %v451_v25 }
  0x49   :  { %405 = vmatmul.mubr.bf16.vlgmr.msra.gmra.mrb[0].mxu1 %v452_v26  ;;  %258 = vmatmul.mubr.bf16.vlgmr.msra.gmra.mrb[0].mxu0 %v452_v26 }
 0x11c   :  { %v302_v27 = vpop.f32.mrb[0].mxu1  ;;  %v259_v28 = vpop.f32.mrb[0].mxu0 }
 0x11d   :  { %332 = vst [vmem:[#allocation8 + $0x10] sm:$0xff] %v302_v27  ;;  %v406_v29 = vpop.f32.mrb[1].mxu1  ;;  %330 = vst [vmem:[#allocation8] sm:$0xff] %v259_v28  ;;  %v261_v30 = vpop.f32.mrb[1].mxu0 }
 0x11e   :  { %v305_v31 = vpop.f32.mrb[2].mxu1  ;;  %331 = vst [vmem:[#allocation8 + $0x8] sm:$0xff] %v261_v30  ;;  %v263_v32 = vpop.f32.mrb[2].mxu0 }
 0x11f   :  { %335 = vst [vmem:[#allocation8 + $0x28] sm:$0xff] %v305_v31  ;;  %v407_v33 = vpop.f32.mrb[3].mxu1  ;;  %333 = vst [vmem:[#allocation8 + $0x18] sm:$0xff] %v263_v32  ;;  %v265_v34 = vpop.f32.mrb[3].mxu0 }
 0x120   :  { %334 = vst [vmem:[#allocation8 + $0x20] sm:$0xff] %v265_v34 }
 0x121   :  { %508 = shalt.err (!%p505_p6)
}
 0x122   :  { %s509_s12 = scalar_lea.hbm %s590_s2, 768 }
 0x123   :  { %p510_p7 = scmp.ne.s32.totalorder %s590_s2, %s509_s12  ;;  %p513_p8 = scmp.lt.u32.totalorder %s509_s12, %s590_s2 }
 0x125   :  { %p515_p9 = pnand %p513_p8, %p510_p7 }
 0x127   :  { %518 = shalt.err (!%p515_p9)
}
 0x128   :  { %s535_s17 = smov 384   ;;  %s536_s18 = smov 24  }
 0x129   :  { %347 = dma.vmem_to_hbm [thread:$0]  %s342_s8, 768, %s590_s2, [#allocation5], %s535_s17, %s535_s17, %s536_s18  }
 0x12a   :  { %523 = dma.done.wait [#allocation5], 768  }
 0x12b   :  { %524 = vsyncadd [#allocation5], 4294966528 }
 0x12c   :  { %351 = vsyncpa [#allocation4], 1 }
 0x12d   :  { %352 = vsyncpa [#allocation7], 1 }
 0x12e   :  { %353 = vsyncpa [#allocation5], 1 }

</bundles_post_ra>
